<compile_context>
chip_gen: v6e
topology: v6e:2x2x1
jax: 0.10.0
libtpu: 0.0.40
codegen_flags: <defaults>
</compile_context>

<pallas_src>
import numpy as np
import jax
import jax.numpy as jnp
from jax import lax
from jax.experimental import pallas as pl
from jax.experimental.pallas import tpu as pltpu

_LANE = 128
_SUBLANE_BF16 = 16          # bf16 packs 16 sublanes per vreg


def _round_up(n, m):
    return ((n + m - 1) // m) * m


def _tpu_defaults():
    """Per-generation tiling / VMEM heuristics (v5e / v6e / v7x)."""
    kind = ""
    try:
        kind = jax.devices()[0].device_kind.lower()
    except Exception:  # pragma: no cover
        pass
    if ("v5 lite" in kind) or ("v5e" in kind):
        return dict(tile_m=256, vmem_cap=96 << 20, num_cores=1,
                    w1_resident_bytes=48 << 20)
    if "v6" in kind:
        return dict(tile_m=512, vmem_cap=96 << 20, num_cores=1,
                    w1_resident_bytes=48 << 20)
    if ("v7" in kind) or ("7x" in kind):
        # v7x: only 64 MiB VMEM per TC, 2 TCs per chip.
        return dict(tile_m=512, vmem_cap=48 << 20, num_cores=2,
                    w1_resident_bytes=12 << 20)
    # unknown / other generation: conservative
    return dict(tile_m=256, vmem_cap=None, num_cores=1,
                w1_resident_bytes=12 << 20)


# ---------------------------------------------------------------------------
# Kernels
# ---------------------------------------------------------------------------
def _reid_kernel(x_ref, w1_ref, b1_ref, w2_ref, b2_ref, out_ref):
    """Whole-D-resident variant: fc1 + relu + fc2 + L2 normalize, one grid axis."""
    h = jnp.dot(x_ref[...], w1_ref[...], preferred_element_type=jnp.float32)
    h = jnp.maximum(h + b1_ref[...], 0.0)
    y = jnp.dot(h.astype(jnp.bfloat16), w2_ref[...],
                preferred_element_type=jnp.float32) + b2_ref[...]
    # F.normalize(p=2, dim=-1, eps=1e-12):  y * rsqrt(max(sum(y^2), eps^2))
    sumsq = jnp.sum(y * y, axis=-1, keepdims=True)
    y = y * lax.rsqrt(jnp.maximum(sumsq, 1e-24))
    out_ref[...] = y.astype(out_ref.dtype)


def _reid_kernel_ktiled(x_ref, w1_ref, b1_ref, w2_ref, b2_ref, out_ref, acc_ref):
    """K-tiled variant: fc1 accumulated over a trailing 'arbitrary' K grid axis."""
    k = pl.program_id(1)

    @pl.when(k == 0)
    def _init():
        acc_ref[...] = jnp.zeros_like(acc_ref)

    acc_ref[...] += jnp.dot(x_ref[...], w1_ref[...],
                            preferred_element_type=jnp.float32)

    @pl.when(k == pl.num_programs(1) - 1)
    def _finish():
        h = jnp.maximum(acc_ref[...] + b1_ref[...], 0.0)
        y = jnp.dot(h.astype(jnp.bfloat16), w2_ref[...],
                    preferred_element_type=jnp.float32) + b2_ref[...]
        sumsq = jnp.sum(y * y, axis=-1, keepdims=True)
        y = y * lax.rsqrt(jnp.maximum(sumsq, 1e-24))
        out_ref[...] = y.astype(out_ref.dtype)


# ---------------------------------------------------------------------------
# Wrapper
# ---------------------------------------------------------------------------
def reid_head_pallas(x, w1, b1, w2, b2, *, out_dtype=jnp.float32,
                     tile_m=None, tile_k=None, weight_buffering=1):
    """Fused reid head: l2normalize(relu(x @ W1 + b1) @ W2 + b2, axis=-1).

    x: [N, D] flattened ROI features.  Returns [N, Do] in `out_dtype`.
    tile_m / tile_k default to per-device-generation choices; tile_k (or a W1
    bigger than the residency budget) enables the K-tiled accumulator kernel.
    """
    N, D = x.shape
    Dh = w1.shape[1]
    Do = w2.shape[1]
    dev = _tpu_defaults()
    if tile_m is None:
        tile_m = dev["tile_m"]
    num_cores = dev["num_cores"]

    if N == 0:
        return jnp.zeros((0, Do), out_dtype)

    # bf16 operands for the MXU; under jit the x cast fuses with the upstream
    # gather/reshape so it does not add an extra HBM pass.
    if x.dtype != jnp.bfloat16:
        x = x.astype(jnp.bfloat16)
    w1 = w1.astype(jnp.bfloat16)
    w2 = w2.astype(jnp.bfloat16)
    b1 = jnp.reshape(b1, (1, Dh)).astype(jnp.float32)
    b2 = jnp.reshape(b2, (1, Do)).astype(jnp.float32)

    # --- row (M) tiling ----------------------------------------------------
    if N <= tile_m:
        steps = num_cores if (num_cores > 1 and N >= 2 * _SUBLANE_BF16) else 1
    else:
        steps = pl.cdiv(N, tile_m)
        if num_cores > 1:
            # keep both v7x TensorCores busy and balanced
            steps = _round_up(max(steps, num_cores), num_cores)
    tm = _round_up(pl.cdiv(N, steps), _SUBLANE_BF16)
    grid_m = pl.cdiv(N, tm)
    if grid_m == 1 and tm > N:
        # single block: pad <=15 rows so the block equals the array extent
        x = jnp.pad(x, ((0, tm - N), (0, 0)))
        n_rows = tm
    else:
        n_rows = N          # partial tail block is masked by Pallas (no full-array pad)

    # --- K tiling over D (gated on W1 size; mandatory for v7x-sized heads) --
    w1_bytes = D * Dh * 2
    k_tiled = (tile_k is not None) or (w1_bytes > dev["w1_resident_bytes"])
    x_in, w1_in = x, w1
    if k_tiled:
        tk = _round_up(min(tile_k if tile_k is not None else 1024, D), _LANE)
        kp = _round_up(D, tk)
        if kp != D:
            # zero-pad the contraction dim (zeros contribute nothing to fc1)
            x_in = jnp.pad(x_in, ((0, 0), (0, kp - D)))
            w1_in = jnp.pad(w1_in, ((0, kp - D), (0, 0)))
    else:
        tk, kp = None, D

    # --- scoped-VMEM limit (defaults: 16 MiB v5e / 32 MiB v6e-v7x) ----------
    out_isz = np.dtype(out_dtype).itemsize
    if k_tiled:
        vmem_est = (2 * tm * tk * 2 + 2 * tk * Dh * 2
                    + 2 * (Dh * 4 + Dh * Do * 2 + Do * 4)
                    + 2 * tm * Do * out_isz + tm * Dh * 4)
    else:
        vmem_est = (2 * tm * kp * 2
                    + 2 * (kp * Dh * 2 + Dh * 4 + Dh * Do * 2 + Do * 4)
                    + 2 * tm * Do * out_isz)
    vmem_limit = None
    if vmem_est > (24 << 20):
        cap = dev["vmem_cap"] or (64 << 20)
        vmem_limit = int(min(cap, _round_up(int(vmem_est * 1.25), 1 << 20)))

    def _inv_spec(shape, index_map, buffering):
        # grid-invariant operand: single-buffer it to halve its VMEM footprint
        if buffering is None:
            return pl.BlockSpec(shape, index_map)
        return pl.BlockSpec(shape, index_map,
                            pipeline_mode=pl.Buffered(buffer_count=buffering))

    def run(buffering):
        if not k_tiled:
            in_specs = [
                pl.BlockSpec((tm, kp), lambda i: (i, 0)),        # x row tiles
                _inv_spec((kp, Dh), lambda i: (0, 0), buffering),  # W1 (resident)
                _inv_spec((1, Dh), lambda i: (0, 0), buffering),
                _inv_spec((Dh, Do), lambda i: (0, 0), buffering),
                _inv_spec((1, Do), lambda i: (0, 0), buffering),
            ]
            out_specs = pl.BlockSpec((tm, Do), lambda i: (i, 0))
            grid = (grid_m,)
            scratch = []
            kernel = _reid_kernel
            dim_sem = ("parallel",)
        else:
            in_specs = [
                pl.BlockSpec((tm, tk), lambda i, k: (i, k)),     # x tiles
                pl.BlockSpec((tk, Dh), lambda i, k: (k, 0)),     # W1 k-tiles (pipelined)
                _inv_spec((1, Dh), lambda i, k: (0, 0), buffering),
                _inv_spec((Dh, Do), lambda i, k: (0, 0), buffering),
                _inv_spec((1, Do), lambda i, k: (0, 0), buffering),
            ]
            out_specs = pl.BlockSpec((tm, Do), lambda i, k: (i, 0))
            grid = (grid_m, kp // tk)                            # K axis last
            scratch = [pltpu.VMEM((tm, Dh), jnp.float32)]
            kernel = _reid_kernel_ktiled
            dim_sem = ("parallel", "arbitrary")
        return pl.pallas_call(
            kernel,
            out_shape=jax.ShapeDtypeStruct((n_rows, Do), out_dtype),
            grid_spec=pltpu.PrefetchScalarGridSpec(
                num_scalar_prefetch=0,
                grid=grid,
                in_specs=in_specs,
                out_specs=out_specs,
                scratch_shapes=scratch),
            compiler_params=pltpu.CompilerParams(
                dimension_semantics=dim_sem,
                vmem_limit_bytes=vmem_limit),
        )(x_in, w1_in, b1, w2, b2)

    try:
        out = run(weight_buffering)
    except Exception:
        if weight_buffering is None:
            raise
        # jax build without single-buffering support: fall back to default specs
        out = run(None)
    return out[:N]


# ---------------------------------------------------------------------------
# Module
# ---------------------------------------------------------------------------
class REIDModuleJAX:
    """JAX/Pallas equivalent of REIDModule (inference path; loss path stubbed)."""

    def __init__(self, in_dim, hidden_dim, out_dim, key,
                 retinanet_on=False, training=False,
                 reid_feat_dtype=jnp.float32):
        k1, k2 = jax.random.split(key, 2)
        # deterministic synthetic parameters (fan-in scaled), bf16 weights
        # (MXU-native), f32 biases.
        self.w1 = (jax.random.normal(k1, (in_dim, hidden_dim), jnp.float32)
                   / jnp.sqrt(jnp.float32(in_dim))).astype(jnp.bfloat16)
        self.b1 = jnp.zeros((1, hidden_dim), jnp.float32)
        self.w2 = (jax.random.normal(k2, (hidden_dim, out_dim), jnp.float32)
                   / jnp.sqrt(jnp.float32(hidden_dim))).astype(jnp.bfloat16)
        self.b2 = jnp.zeros((1, out_dim), jnp.float32)
        self.retinanet_on = retinanet_on
        self.training = training
        self.reid_feat_dtype = reid_feat_dtype  # set to jnp.bfloat16 to halve output traffic

    def __call__(self, features, results, targets=None):
        # features: list of per-image candidate ROI feature tensors [Ni, C, H, W]
        # results : list of dicts with 'index' (selected rows) and 'len'
        if (not self.retinanet_on) and (not self.training) and (targets is None):
            inds = [r["index"] for r in results]
            feats = jnp.concatenate(
                [feat[ind] for feat, ind in zip(features, inds)], axis=0)
        else:
            feats = features
        n = feats.shape[0]
        # flatten NCHW -> [N, C*H*W]; bf16 cast adjacent to the gather so it
        # fuses under jit (no separate full-array pass).
        x = feats.reshape(n, -1).astype(jnp.bfloat16)
        reid_feats = reid_head_pallas(x, self.w1, self.b1, self.w2, self.b2,
                                      out_dtype=self.reid_feat_dtype)

        num_feats = 0
        for r in results:
            l_res = r["len"]
            r["reid_feat"] = reid_feats[num_feats:num_feats + l_res]
            num_feats += l_res

        if not self.training:
            return reid_feats, results, {}
        # TODO(synk): reid loss evaluator (OIM / identity cross-entropy) not implemented
        return reid_feats, results, {"loss_reid": jnp.float32(0.0)}


# ---------------------------------------------------------------------------
# Demo / self-test
# ---------------------------------------------------------------------------
if __name__ == "__main__":
    key = jax.random.PRNGKey(0)
    k_feat0, k_feat1, k_params, k_big = jax.random.split(key, 4)

    C, H, W = 4, 8, 8          # ROI-pooled feature map size (NCHW)
    D_in = C * H * W           # 256
    D_hidden, D_out = 128, 128

    # two images, 6 candidate ROI features each; each result keeps 4 of them
    features = [
        jax.random.normal(k_feat0, (6, C, H, W), jnp.float32),
        jax.random.normal(k_feat1, (6, C, H, W), jnp.float32),
    ]
    results = [
        {"index": jnp.array([0, 2, 3, 5], dtype=jnp.int32), "len": 4},
        {"index": jnp.array([1, 2, 4, 5], dtype=jnp.int32), "len": 4},
    ]

    module = REIDModuleJAX(D_in, D_hidden, D_out, k_params)
    feats, results, losses = module(features, results, targets=None)
    feats = jax.block_until_ready(feats)

    norms = jnp.linalg.norm(feats.astype(jnp.float32), axis=-1)
    assert feats.shape == (8, D_out)
    assert bool(jnp.all(jnp.abs(norms - 1.0) < 1e-3))
    assert results[0]["reid_feat"].shape == (4, D_out)
    assert results[1]["reid_feat"].shape == (4, D_out)

    # --- check the multi-tile (masked tail) and K-tiled paths vs pure JAX ---
    def ref_head(x, w1, b1, w2, b2):
        xb = x.astype(jnp.bfloat16)
        h = jnp.dot(xb, w1.astype(jnp.bfloat16),
                    preferred_element_type=jnp.float32) + b1
        h = jnp.maximum(h, 0.0)
        y = jnp.dot(h.astype(jnp.bfloat16), w2.astype(jnp.bfloat16),
                    preferred_element_type=jnp.float32) + b2
        return y * lax.rsqrt(
            jnp.maximum(jnp.sum(y * y, axis=-1, keepdims=True), 1e-24))

    N_big = 200   # not a multiple of the row tile -> exercises the masked tail block
    x_big = jax.random.normal(k_big, (N_big, D_in), jnp.float32)
    want = ref_head(x_big, module.w1, module.b1, module.w2, module.b2)

    got_tiled = reid_head_pallas(x_big, module.w1, module.b1, module.w2,
                                 module.b2, tile_m=64)
    got_ktiled = reid_head_pallas(x_big, module.w1, module.b1, module.w2,
                                  module.b2, tile_m=64, tile_k=128,
                                  out_dtype=jnp.bfloat16)
    got_tiled, got_ktiled = jax.block_until_ready((got_tiled, got_ktiled))
    assert got_tiled.shape == (N_big, D_out)
    assert got_ktiled.shape == (N_big, D_out)
    assert bool(jnp.max(jnp.abs(got_tiled - want)) < 5e-3)
    assert bool(jnp.max(jnp.abs(got_ktiled.astype(jnp.float32) - want)) < 2e-2)

    print("KERNEL_OK")
</pallas_src>

<mosaic_0001>
module attributes {stable_mosaic.version = 11 : i64} {
  func.func @_reid_kernel(%arg0: i32, %arg1: memref<16x256xbf16, #tpu.memory_space<vmem>>, %arg2: memref<256x128xbf16, #tpu.memory_space<vmem>>, %arg3: memref<1x128xf32, #tpu.memory_space<vmem>>, %arg4: memref<128x128xbf16, #tpu.memory_space<vmem>>, %arg5: memref<1x128xf32, #tpu.memory_space<vmem>>, %arg6: memref<16x128xf32, #tpu.memory_space<vmem>>) attributes {dimension_semantics = [#tpu.dimension_semantics<parallel>], iteration_bounds = array<i64: 1>, scalar_prefetch = 0 : i64, scratch_operands = 0 : i64, tpu.core_type = #tpu.core_type<tc>, window_params = [{transform_indices = @transform_0, window_bounds = array<i64: 16, 256>}, {pipeline_mode = #tpu.pipeline_mode<synchronous>, transform_indices = @transform_1, window_bounds = array<i64: 256, 128>}, {pipeline_mode = #tpu.pipeline_mode<synchronous>, transform_indices = @transform_2, window_bounds = array<i64: 1, 128>}, {pipeline_mode = #tpu.pipeline_mode<synchronous>, transform_indices = @transform_3, window_bounds = array<i64: 128, 128>}, {pipeline_mode = #tpu.pipeline_mode<synchronous>, transform_indices = @transform_4, window_bounds = array<i64: 1, 128>}, {transform_indices = @transform_5, window_bounds = array<i64: 16, 128>}]} {
    %c0 = arith.constant 0 : index
    %c0_0 = arith.constant 0 : index
    %0 = vector.load %arg1[%c0, %c0_0] : memref<16x256xbf16, #tpu.memory_space<vmem>>, vector<16x256xbf16>
    %c0_1 = arith.constant 0 : index
    %c0_2 = arith.constant 0 : index
    %1 = vector.load %arg2[%c0_1, %c0_2] : memref<256x128xbf16, #tpu.memory_space<vmem>>, vector<256x128xbf16>
    %cst = arith.constant dense<0.000000e+00> : vector<16x128xf32>
    %2 = tpu.matmul %0, %1, %cst {dimension_numbers = #tpu.dot_dimension_numbers<[1], [0], [0], [1], [0, 0, 1, 1], [], []>} : vector<16x256xbf16>, vector<256x128xbf16>, vector<16x128xf32> -> vector<16x128xf32>
    %c0_3 = arith.constant 0 : index
    %c0_4 = arith.constant 0 : index
    %3 = vector.load %arg3[%c0_3, %c0_4] : memref<1x128xf32, #tpu.memory_space<vmem>>, vector<1x128xf32>
    %4 = vector.broadcast %3 : vector<1x128xf32> to vector<16x128xf32>
    %5 = arith.addf %2, %4 : vector<16x128xf32>
    %cst_5 = arith.constant 0.000000e+00 : f32
    %6 = vector.broadcast %cst_5 : f32 to vector<16x128xf32>
    %7 = arith.maximumf %5, %6 : vector<16x128xf32>
    %8 = arith.truncf %7 : vector<16x128xf32> to vector<16x128xbf16>
    %c0_6 = arith.constant 0 : index
    %c0_7 = arith.constant 0 : index
    %9 = vector.load %arg4[%c0_6, %c0_7] : memref<128x128xbf16, #tpu.memory_space<vmem>>, vector<128x128xbf16>
    %cst_8 = arith.constant dense<0.000000e+00> : vector<16x128xf32>
    %10 = tpu.matmul %8, %9, %cst_8 {dimension_numbers = #tpu.dot_dimension_numbers<[1], [0], [0], [1], [0, 0, 1, 1], [], []>} : vector<16x128xbf16>, vector<128x128xbf16>, vector<16x128xf32> -> vector<16x128xf32>
    %c0_9 = arith.constant 0 : index
    %c0_10 = arith.constant 0 : index
    %11 = vector.load %arg5[%c0_9, %c0_10] : memref<1x128xf32, #tpu.memory_space<vmem>>, vector<1x128xf32>
    %12 = vector.broadcast %11 : vector<1x128xf32> to vector<16x128xf32>
    %13 = arith.addf %10, %12 : vector<16x128xf32>
    %14 = arith.mulf %13, %13 : vector<16x128xf32>
    %cst_11 = arith.constant dense<0.000000e+00> : vector<16xf32>
    %15 = vector.multi_reduction <add>, %14, %cst_11 [1] : vector<16x128xf32> to vector<16xf32>
    %16 = vector.shape_cast %15 : vector<16xf32> to vector<16x1xf32>
    %cst_12 = arith.constant 1.000000e-24 : f32
    %17 = vector.broadcast %cst_12 : f32 to vector<16x1xf32>
    %18 = arith.maximumf %16, %17 : vector<16x1xf32>
    %19 = math.rsqrt %18 : vector<16x1xf32>
    %20 = vector.broadcast %19 : vector<16x1xf32> to vector<16x128xf32>
    %21 = arith.mulf %13, %20 : vector<16x128xf32>
    %c0_13 = arith.constant 0 : index
    %c0_14 = arith.constant 0 : index
    %22 = vector.load %arg6[%c0_13, %c0_14] : memref<16x128xf32, #tpu.memory_space<vmem>>, vector<16x128xf32>
    tpu.vector_store %arg6[%c0_13, %c0_14], %21 {strides = array<i32>} : memref<16x128xf32, #tpu.memory_space<vmem>>, vector<16x128xf32>,
    return
  }
  func.func @transform_0(%arg0: i32) -> (i32, i32) {
    %c0_i32 = arith.constant 0 : i32
    %c0_i32_0 = arith.constant 0 : i32
    return %arg0, %c0_i32 : i32, i32
  }
  func.func @transform_1(%arg0: i32) -> (i32, i32) {
    %c0_i32 = arith.constant 0 : i32
    %c0_i32_0 = arith.constant 0 : i32
    %c0_i32_1 = arith.constant 0 : i32
    return %c0_i32, %c0_i32_0 : i32, i32
  }
  func.func @transform_2(%arg0: i32) -> (i32, i32) {
    %c0_i32 = arith.constant 0 : i32
    %c0_i32_0 = arith.constant 0 : i32
    %c0_i32_1 = arith.constant 0 : i32
    return %c0_i32, %c0_i32_0 : i32, i32
  }
  func.func @transform_3(%arg0: i32) -> (i32, i32) {
    %c0_i32 = arith.constant 0 : i32
    %c0_i32_0 = arith.constant 0 : i32
    %c0_i32_1 = arith.constant 0 : i32
    return %c0_i32, %c0_i32_0 : i32, i32
  }
  func.func @transform_4(%arg0: i32) -> (i32, i32) {
    %c0_i32 = arith.constant 0 : i32
    %c0_i32_0 = arith.constant 0 : i32
    %c0_i32_1 = arith.constant 0 : i32
    return %c0_i32, %c0_i32_0 : i32, i32
  }
  func.func @transform_5(%arg0: i32) -> (i32, i32) {
    %c0_i32 = arith.constant 0 : i32
    %c0_i32_0 = arith.constant 0 : i32
    return %arg0, %c0_i32 : i32, i32
  }
}

module attributes {stable_mosaic.version = 11 : i64} {
  func.func @_reid_kernel(%arg0: i32, %arg1: memref<16x256xbf16, #tpu.memory_space<vmem>>, %arg2: memref<256x128xbf16, #tpu.memory_space<vmem>>, %arg3: memref<1x128xf32, #tpu.memory_space<vmem>>, %arg4: memref<128x128xbf16, #tpu.memory_space<vmem>>, %arg5: memref<1x128xf32, #tpu.memory_space<vmem>>, %arg6: memref<16x128xf32, #tpu.memory_space<vmem>>) attributes {dimension_semantics = [#tpu.dimension_semantics<parallel>], iteration_bounds = array<i64: 1>, scalar_prefetch = 0 : i64, scratch_operands = 0 : i64, tpu.core_type = #tpu.core_type<tc>, window_params = [{transform_indices = @transform_0, window_bounds = array<i64: 16, 256>}, {pipeline_mode = #tpu.pipeline_mode<synchronous>, transform_indices = @transform_1, window_bounds = array<i64: 256, 128>}, {pipeline_mode = #tpu.pipeline_mode<synchronous>, transform_indices = @transform_2, window_bounds = array<i64: 1, 128>}, {pipeline_mode = #tpu.pipeline_mode<synchronous>, transform_indices = @transform_3, window_bounds = array<i64: 128, 128>}, {pipeline_mode = #tpu.pipeline_mode<synchronous>, transform_indices = @transform_4, window_bounds = array<i64: 1, 128>}, {transform_indices = @transform_5, window_bounds = array<i64: 16, 128>}]} {
    %c0 = arith.constant 0 : index
    %c0_0 = arith.constant 0 : index
    %0 = vector.load %arg1[%c0, %c0_0] : memref<16x256xbf16, #tpu.memory_space<vmem>>, vector<16x256xbf16>
    %c0_1 = arith.constant 0 : index
    %c0_2 = arith.constant 0 : index
    %1 = vector.load %arg2[%c0_1, %c0_2] : memref<256x128xbf16, #tpu.memory_space<vmem>>, vector<256x128xbf16>
    %cst = arith.constant dense<0.000000e+00> : vector<16x128xf32>
    %2 = tpu.matmul %0, %1, %cst {dimension_numbers = #tpu.dot_dimension_numbers<[1], [0], [0], [1], [0, 0, 1, 1], [], []>} : vector<16x256xbf16>, vector<256x128xbf16>, vector<16x128xf32> -> vector<16x128xf32>
    %c0_3 = arith.constant 0 : index
    %c0_4 = arith.constant 0 : index
    %3 = vector.load %arg3[%c0_3, %c0_4] : memref<1x128xf32, #tpu.memory_space<vmem>>, vector<1x128xf32>
    %4 = vector.broadcast %3 : vector<1x128xf32> to vector<16x128xf32>
    %5 = arith.addf %2, %4 : vector<16x128xf32>
    %cst_5 = arith.constant 0.000000e+00 : f32
    %6 = vector.broadcast %cst_5 : f32 to vector<16x128xf32>
    %7 = arith.maximumf %5, %6 : vector<16x128xf32>
    %8 = arith.truncf %7 : vector<16x128xf32> to vector<16x128xbf16>
    %c0_6 = arith.constant 0 : index
    %c0_7 = arith.constant 0 : index
    %9 = vector.load %arg4[%c0_6, %c0_7] : memref<128x128xbf16, #tpu.memory_space<vmem>>, vector<128x128xbf16>
    %cst_8 = arith.constant dense<0.000000e+00> : vector<16x128xf32>
    %10 = tpu.matmul %8, %9, %cst_8 {dimension_numbers = #tpu.dot_dimension_numbers<[1], [0], [0], [1], [0, 0, 1, 1], [], []>} : vector<16x128xbf16>, vector<128x128xbf16>, vector<16x128xf32> -> vector<16x128xf32>
    %c0_9 = arith.constant 0 : index
    %c0_10 = arith.constant 0 : index
    %11 = vector.load %arg5[%c0_9, %c0_10] : memref<1x128xf32, #tpu.memory_space<vmem>>, vector<1x128xf32>
    %12 = vector.broadcast %11 : vector<1x128xf32> to vector<16x128xf32>
    %13 = arith.addf %10, %12 : vector<16x128xf32>
    %14 = arith.mulf %13, %13 : vector<16x128xf32>
    %cst_11 = arith.constant dense<0.000000e+00> : vector<16xf32>
    %15 = vector.multi_reduction <add>, %14, %cst_11 [1] : vector<16x128xf32> to vector<16xf32>
    %16 = vector.shape_cast %15 : vector<16xf32> to vector<16x1xf32>
    %cst_12 = arith.constant 1.000000e-24 : f32
    %17 = vector.broadcast %cst_12 : f32 to vector<16x1xf32>
    %18 = arith.maximumf %16, %17 : vector<16x1xf32>
    %19 = math.rsqrt %18 : vector<16x1xf32>
    %20 = vector.broadcast %19 : vector<16x1xf32> to vector<16x128xf32>
    %21 = arith.mulf %13, %20 : vector<16x128xf32>
    %c0_13 = arith.constant 0 : index
    %c0_14 = arith.constant 0 : index
    %22 = vector.load %arg6[%c0_13, %c0_14] : memref<16x128xf32, #tpu.memory_space<vmem>>, vector<16x128xf32>
    tpu.vector_store %arg6[%c0_13, %c0_14], %21 {strides = array<i32>} : memref<16x128xf32, #tpu.memory_space<vmem>>, vector<16x128xf32>,
    return
  }
  func.func @transform_0(%arg0: i32) -> (i32, i32) {
    %c0_i32 = arith.constant 0 : i32
    %c0_i32_0 = arith.constant 0 : i32
    return %arg0, %c0_i32 : i32, i32
  }
  func.func @transform_1(%arg0: i32) -> (i32, i32) {
    %c0_i32 = arith.constant 0 : i32
    %c0_i32_0 = arith.constant 0 : i32
    %c0_i32_1 = arith.constant 0 : i32
    return %c0_i32, %c0_i32_0 : i32, i32
  }
  func.func @transform_2(%arg0: i32) -> (i32, i32) {
    %c0_i32 = arith.constant 0 : i32
    %c0_i32_0 = arith.constant 0 : i32
    %c0_i32_1 = arith.constant 0 : i32
    return %c0_i32, %c0_i32_0 : i32, i32
  }
  func.func @transform_3(%arg0: i32) -> (i32, i32) {
    %c0_i32 = arith.constant 0 : i32
    %c0_i32_0 = arith.constant 0 : i32
    %c0_i32_1 = arith.constant 0 : i32
    return %c0_i32, %c0_i32_0 : i32, i32
  }
  func.func @transform_4(%arg0: i32) -> (i32, i32) {
    %c0_i32 = arith.constant 0 : i32
    %c0_i32_0 = arith.constant 0 : i32
    %c0_i32_1 = arith.constant 0 : i32
    return %c0_i32, %c0_i32_0 : i32, i32
  }
  func.func @transform_5(%arg0: i32) -> (i32, i32) {
    %c0_i32 = arith.constant 0 : i32
    %c0_i32_0 = arith.constant 0 : i32
    return %arg0, %c0_i32 : i32, i32
  }
}

</mosaic_0001>

<bundles_post_ra>
// kernel: tpu_custom_call.1
= control target key start
LH: loop header
LB: loop body
LE: loop exit
PB: predicated region body
PF: predicated region fallthrough
CT: control target
= control target key end

     0   :  { %10 = vsyncpa [#allocation3], 0  ;;  %s668_s0 = inlined_call_operand.hbm [shape: bf16[16,256], index: 0, kind: input, shape index: {}]   ;;  %s669_s1 = inlined_call_operand.hbm [shape: bf16[256,128], index: 1, kind: input, shape index: {}]   ;;  %s670_s2 = inlined_call_operand.vmem [shape: f32[1,128], index: 2, kind: input, shape index: {}]   ;;  %s671_s3 = inlined_call_operand.hbm [shape: bf16[128,128], index: 3, kind: input, shape index: {}]   ;;  %s672_s4 = inlined_call_operand.vmem [shape: f32[1,128], index: 4, kind: input, shape index: {}]   ;;  %s673_s5 = inlined_call_operand.hbm [shape: f32[16,128], index: 5, kind: output, shape index: {}]  }
   0x1   :  { %11 = vsyncpa [#allocation6], 0 }
   0x2   :  { %12 = vsyncpa [#allocation4], 0  ;;  %s604_s18 = smov [#allocation5]  }
   0x3   :  { %s30_s19 = sshll.u32 %s604_s18, 4  ;;  %s31_s19 = int_to_ptr.vmem [resolvable:$true] %s30_s19 }
   0x4   :  { %s526_s20 = scalar_lea.vmem %s31_s19, 2048  ;;  %p531_p1 = scmp.lt.s32.totalorder %s31_s19, %s31_s19 }
   0x5   :  { %p527_p0 = scmp.ne.s32.totalorder %s31_s19, %s526_s20  ;;  %p532_p2 = scmp.lt.s32.totalorder %s526_s20, %s526_s20 }
   0x7   :  { %p533_p3 = por %p532_p2, %p531_p1 }
   0x9   :  { %p534_p4 = pnand %p533_p3, %p527_p0 }
   0xb   :  { %537 = shalt.err (!%p534_p4)
}
   0xc   :  { %s605_s21 = smov 64   ;;  %s606_s22 = smov 4  }
   0xd   :  { %36 = dma.hbm_to_vmem [thread:$0]  %s669_s1, 2048, %s31_s19, [#allocation6], %s605_s21, %s605_s21, %s606_s22  }
   0xe   :  { %s607_s25 = smov [#allocation2]  }
   0xf   :  { %s18_s26 = sshll.u32 %s607_s25, 4  ;;  %s19_s26 = int_to_ptr.vmem [resolvable:$true] %s18_s26 }
  0x10   :  { %s546_s27 = scalar_lea.vmem %s19_s26, 256  ;;  %p551_p6 = scmp.lt.s32.totalorder %s19_s26, %s19_s26 }
  0x11   :  { %p547_p5 = scmp.ne.s32.totalorder %s19_s26, %s546_s27  ;;  %p552_p7 = scmp.lt.s32.totalorder %s546_s27, %s546_s27 }
  0x13   :  { %p553_p8 = por %p552_p7, %p551_p6 }
  0x15   :  { %p554_p9 = pnand %p553_p8, %p547_p5 }
  0x17   :  { %557 = shalt.err (!%p554_p9)
}
  0x18   :  { %s608_s28 = smov 128   ;;  %s609_s29 = smov 8  }
  0x19   :  { %24 = dma.hbm_to_vmem [thread:$0]  %s668_s0, 256, %s19_s26, [#allocation3], %s608_s28, %s608_s28, %s609_s29  }
  0x1a   :  { %s610_s1 = smov [#allocation7]  }
  0x1b   :  { %s44_s7 = sshll.u32 %s610_s1, 4  ;;  %s45_s7 = int_to_ptr.vmem [resolvable:$true] %s44_s7 }
  0x1c   :  { %s566_s8 = scalar_lea.vmem %s45_s7, 1024  ;;  %p571_p11 = scmp.lt.s32.totalorder %s45_s7, %s45_s7 }
  0x1d   :  { %p567_p10 = scmp.ne.s32.totalorder %s45_s7, %s566_s8  ;;  %p572_p12 = scmp.lt.s32.totalorder %s566_s8, %s566_s8 }
  0x1f   :  { %p573_p13 = por %p572_p12, %p571_p11 }
  0x21   :  { %p574_p0 = pnand %p573_p13, %p567_p10 }
  0x23   :  { %577 = shalt.err (!%p574_p0)
}
  0x24   :  { %50 = dma.hbm_to_vmem [thread:$0]  %s671_s3, 1024, %s45_s7, [#allocation6], %s605_s21, %s605_s21, %s606_s22  }
  0x25   :  { %598 = dma.done.wait [#allocation3], 256  }
  0x26   :  { %599 = vsyncadd [#allocation3], 4294967040 }
  0x27   :  { %600 = dma.done.wait [#allocation6], 3072  }
  0x28   :  { %601 = vsyncadd [#allocation6], 4294964224  ;;  %v611_v0 = vmov 0.0   ;;  %v487_v1 = vld [vmem:[#allocation5 + $0x78] sm:$0xff]   ;;  %v489_v3 = vld [vmem:[#allocation5 + $0x70] sm:$0xff]   ;;  %vm612_vm0 = vmmov 0  }
  0x29   :  { %457 = vmatprep.subr.bf16.mxu1 %v611_v0  ;;  %v488_v2 = vld [vmem:[#allocation5 + $0x38] sm:$0xff]   ;;  %426 = vmatprep.subr.bf16.mxu0 %v487_v1  ;;  %v490_v4 = vld [vmem:[#allocation5 + $0x30] sm:$0xff]   ;;  %v491_v5 = vld [vmem:[#allocation5 + $0x68] sm:$0xff]  }
  0x2a   :  { %427 = vmatpush3.bf16.msra.mxu0 %v488_v2  ;;  %v492_v6 = vld [vmem:[#allocation5 + $0x28] sm:$0xff]   ;;  %v493_v7 = vld [vmem:[#allocation5 + $0x60] sm:$0xff]   ;;  %v495_v9 = vld [vmem:[#allocation5 + $0x58] sm:$0xff]   ;;  %473 = vmatprep.mubr.msk.bf16.mxu1 %vm612_vm0, %v611_v0 }
  0x2b   :  { %428 = vmatprep.subr.bf16.mxu0 %v489_v3  ;;  %v494_v8 = vld [vmem:[#allocation5 + $0x20] sm:$0xff]   ;;  %v496_v10 = vld [vmem:[#allocation5 + $0x18] sm:$0xff]   ;;  %v497_v11 = vld [vmem:[#allocation5 + $0x50] sm:$0xff]  }
  0x2c   :  { %v498_v12 = vld [vmem:[#allocation5 + $0x10] sm:$0xff]   ;;  %v506_v14 = vld [vmem:[#allocation7 + $0x38] sm:$0xff]   ;;  %v499_v15 = vld [vmem:[#allocation5 + $0x48] sm:$0xff]  }
  0x2d   :  { %v505_v13 = vld [vmem:[#allocation2 + $0x4] ss:$8 sps:$4 sm:$0xff]   ;;  %458 = vmatpush3.bf16.msra.mxu1 %v506_v14  ;;  %v500_v17 = vld [vmem:[#allocation5 + $0x8] sm:$0xff]   ;;  %v501_v18 = vld [vmem:[#allocation5 + $0x40] sm:$0xff]  }
  0x2e   :  { %429 = vmatpush3.bf16.msra.mxu0 %v490_v4  ;;  %242 = vmatprep.mubr.bf16.mxu0 %v505_v13  ;;  %v507_v16 = vld [vmem:[#allocation7 + $0x30] sm:$0xff]   ;;  %v508_v19 = vld [vmem:[#allocation7 + $0x28] sm:$0xff]   ;;  %v502_v20 = vld [vmem:[#allocation5] sm:$0xff]  }
  0x2f   :  { %430 = vmatprep.subr.bf16.mxu0 %v491_v5  ;;  %459 = vmatprep.subr.bf16.mxu1 %v611_v0  ;;  %v509_v21 = vld [vmem:[#allocation7 + $0x20] sm:$0xff]   ;;  %v503_v22 = vld [vmem:[#allocation2] ss:$8 sps:$4 sm:$0xff]   ;;  %v512_v25 = vld [vmem:[#allocation7 + $0x8] sm:$0xff]  }
  0x30   :  { %v510_v23 = vld [vmem:[#allocation7 + $0x18] sm:$0xff]   ;;  %v511_v24 = vld [vmem:[#allocation7 + $0x10] sm:$0xff]   ;;  %v513_v26 = vld [vmem:[#allocation7] sm:$0xff]  }
  0x31   :  { %460 = vmatpush3.bf16.msra.mxu1 %v507_v16  ;;  %v398_v30 = vld [vmem:[%s670_s2] ss:$0 sm:$0xff]  ;;  %s613_s2 = smov [#allocation8]  }
  0x32   :  { %431 = vmatpush3.bf16.msra.mxu0 %v492_v6  ;;  %461 = vmatprep.subr.bf16.mxu1 %v611_v0  ;;  %v417_v39 = vld [vmem:[%s672_s4] ss:$0 sm:$0xff]  ;;  %s385_s4 = sshll.u32 %s613_s2, 4  ;;  %s386_s4 = int_to_ptr.vmem [resolvable:$true] %s385_s4 }
  0x33   :  { %432 = vmatprep.subr.bf16.mxu0 %v493_v7  ;;  %s578_s13 = scalar_lea.vmem %s386_s4, 256  ;;  %p583_p2 = scmp.lt.s32.totalorder %s386_s4, %s386_s4 }
  0x34   :  { %p579_p1 = scmp.ne.s32.totalorder %s386_s4, %s578_s13  ;;  %p584_p3 = scmp.lt.s32.totalorder %s578_s13, %s578_s13 }
  0x35   :  { %462 = vmatpush3.bf16.msra.mxu1 %v508_v19 }
  0x36   :  { %433 = vmatpush3.bf16.msra.mxu0 %v494_v8  ;;  %463 = vmatprep.subr.bf16.mxu1 %v611_v0  ;;  %p585_p4 = por %p584_p3, %p583_p2 }
  0x37   :  { %434 = vmatprep.subr.bf16.mxu0 %v495_v9 }
  0x38   :  { %p586_p5 = pnand %p585_p4, %p579_p1 }
  0x39   :  { %464 = vmatpush3.bf16.msra.mxu1 %v509_v21 }
  0x3a   :  { %435 = vmatpush3.bf16.msra.mxu0 %v496_v10  ;;  %465 = vmatprep.subr.bf16.mxu1 %v611_v0 }
  0x3b   :  { %436 = vmatprep.subr.bf16.mxu0 %v497_v11 }
  0x3d   :  { %466 = vmatpush3.bf16.msra.mxu1 %v510_v23 }
  0x3e   :  { %437 = vmatpush3.bf16.msra.mxu0 %v498_v12  ;;  %467 = vmatprep.subr.bf16.mxu1 %v611_v0 }
  0x3f   :  { %438 = vmatprep.subr.bf16.mxu0 %v499_v15 }
  0x41   :  { %468 = vmatpush3.bf16.msra.mxu1 %v511_v24 }
  0x42   :  { %439 = vmatpush3.bf16.msra.mxu0 %v500_v17  ;;  %469 = vmatprep.subr.bf16.mxu1 %v611_v0 }
  0x43   :  { %440 = vmatprep.subr.bf16.mxu0 %v501_v18 }
  0x45   :  { %470 = vmatpush3.bf16.msra.mxu1 %v512_v25 }
  0x46   :  { %441 = vmatpush3.bf16.msra.mxu0 %v502_v20  ;;  %471 = vmatprep.subr.bf16.mxu1 %v611_v0 }
  0x49   :  { %243 = vmatmul.mubr.bf16.vlgmr.msra.gmra.mxu0 %v503_v22  ;;  %472 = vmatpush3.bf16.msra.mxu1 %v513_v26 }
 0x109   :  { %v442_v27 = vpop.f32.mrf.mxu0 }
 0x10b   :  { %v443_v28 = vpop.f32.mrf.mxu0 }
 0x10c   :  { %v444_v29 = vadd.f32 %v443_v28, %v442_v27 }
 0x10d   :  { %v445_v31 = vpop.f32.mrf.mxu0 }
 0x10e   :  { %v245_v33 = vadd.f32 %v444_v29, %v398_v30 }
 0x10f   :  { %v446_v32 = vpop.f32.mrf.mxu0 }
 0x110   :  { %v447_v34 = vadd.f32 %v446_v32, %v445_v31  ;;  %v251_v36 = vmax.f32 %v245_v33, 0.0 }
 0x112   :  { %v248_v35 = vadd.f32 %v447_v34, %v398_v30 }
 0x114   :  { %v252_v37 = vmax.f32 %v248_v35, 0.0 }
 0x116   :  { %v253_v38 = vpack.c.bf16 %v252_v37, %v251_v36 }
 0x118   :  { %474 = vmatmul.mubr.bf16.vlgmr.msra.gmra.mxu1 %v253_v38 }
 0x1d8   :  { %v359_v40 = vpop.f32.mrf.mxu1 }
 0x1d9   :  { %v360_v41 = vadd.f32 %v417_v39, %v359_v40 }
 0x1da   :  { %v475_v42 = vpop.f32.mrf.mxu1 }
 0x1db   :  { %v366_v43 = vmul.f32 %v360_v41, %v360_v41 }
 0x1dc   :  { %v362_v44 = vpop.f32.mrf.mxu1 }
 0x1dd   :  { %v363_v45 = vadd.f32 %v417_v39, %v362_v44  ;;  %368 = vadd.xlane.f32.xlu0 %v366_v43 }
 0x1de   :  { %v476_v46 = vpop.f32.mrf.mxu1 }
 0x1df   :  { %v367_v47 = vmul.f32 %v363_v45, %v363_v45 }
 0x1e1   :  { %370 = vadd.xlane.f32.xlu0 %v367_v47 }
 0x266   :  { %v369_v48 = vpop.xlane.xlu0 %368 }
 0x267   :  { %v372_v49 = vmax.f32 %v369_v48, 1e-24 }
 0x269   :  { %514 = vrsqrt.f32 %v372_v49 }
 0x26a   :  { %v371_v50 = vpop.xlane.xlu0 %370 }
 0x26b   :  { %v373_v51 = vmax.f32 %v371_v50, 1e-24 }
 0x26d   :  { %516 = vrsqrt.f32 %v373_v51 }
 0x276   :  { %v515_v52 = vpop.eup %514 }
 0x277   :  { %v376_v53 = vmul.f32 %v515_v52, %v360_v41 }
 0x279   :  { %378 = vst [vmem:[#allocation8] sm:$0xff] %v376_v53 }
 0x27a   :  { %v517_v54 = vpop.eup %516 }
 0x27b   :  { %v377_v55 = vmul.f32 %v517_v54, %v363_v45 }
 0x27d   :  { %379 = vst [vmem:[#allocation8 + $0x8] sm:$0xff] %v377_v55 }
 0x27e   :  { %589 = shalt.err (!%p586_p5)
}
 0x27f   :  { %391 = dma.vmem_to_hbm [thread:$0]  %s386_s4, 256, %s673_s5, [#allocation4], %s608_s28, %s608_s28, %s609_s29  }
 0x280   :  { %602 = dma.done.wait [#allocation4], 256  }
 0x281   :  { %603 = vsyncadd [#allocation4], 4294967040 }
 0x282   :  { %395 = vsyncpa [#allocation3], 1 }
 0x283   :  { %396 = vsyncpa [#allocation6], 1 }
 0x284   :  { %397 = vsyncpa [#allocation4], 1 }

// kernel: tpu_custom_call.1
= control target key start
LH: loop header
LB: loop body
LE: loop exit
PB: predicated region body
PF: predicated region fallthrough
CT: control target
= control target key end

     0   :  { %10 = vsyncpa [#allocation3], 0  ;;  %s668_s0 = inlined_call_operand.hbm [shape: bf16[16,256], index: 0, kind: input, shape index: {}]   ;;  %s669_s1 = inlined_call_operand.hbm [shape: bf16[256,128], index: 1, kind: input, shape index: {}]   ;;  %s670_s2 = inlined_call_operand.vmem [shape: f32[1,128], index: 2, kind: input, shape index: {}]   ;;  %s671_s3 = inlined_call_operand.hbm [shape: bf16[128,128], index: 3, kind: input, shape index: {}]   ;;  %s672_s4 = inlined_call_operand.vmem [shape: f32[1,128], index: 4, kind: input, shape index: {}]   ;;  %s673_s5 = inlined_call_operand.hbm [shape: f32[16,128], index: 5, kind: output, shape index: {}]  }
   0x1   :  { %11 = vsyncpa [#allocation6], 0 }
   0x2   :  { %12 = vsyncpa [#allocation4], 0  ;;  %s604_s18 = smov [#allocation5]  }
   0x3   :  { %s30_s19 = sshll.u32 %s604_s18, 4  ;;  %s31_s19 = int_to_ptr.vmem [resolvable:$true] %s30_s19 }
   0x4   :  { %s526_s20 = scalar_lea.vmem %s31_s19, 2048  ;;  %p531_p1 = scmp.lt.s32.totalorder %s31_s19, %s31_s19 }
   0x5   :  { %p527_p0 = scmp.ne.s32.totalorder %s31_s19, %s526_s20  ;;  %p532_p2 = scmp.lt.s32.totalorder %s526_s20, %s526_s20 }
   0x7   :  { %p533_p3 = por %p532_p2, %p531_p1 }
   0x9   :  { %p534_p4 = pnand %p533_p3, %p527_p0 }
   0xb   :  { %537 = shalt.err (!%p534_p4)
}
   0xc   :  { %s605_s21 = smov 64   ;;  %s606_s22 = smov 4  }
   0xd   :  { %36 = dma.hbm_to_vmem [thread:$0]  %s669_s1, 2048, %s31_s19, [#allocation6], %s605_s21, %s605_s21, %s606_s22  }
   0xe   :  { %s607_s25 = smov [#allocation2]  }
   0xf   :  { %s18_s26 = sshll.u32 %s607_s25, 4  ;;  %s19_s26 = int_to_ptr.vmem [resolvable:$true] %s18_s26 }
  0x10   :  { %s546_s27 = scalar_lea.vmem %s19_s26, 256  ;;  %p551_p6 = scmp.lt.s32.totalorder %s19_s26, %s19_s26 }
  0x11   :  { %p547_p5 = scmp.ne.s32.totalorder %s19_s26, %s546_s27  ;;  %p552_p7 = scmp.lt.s32.totalorder %s546_s27, %s546_s27 }
  0x13   :  { %p553_p8 = por %p552_p7, %p551_p6 }
  0x15   :  { %p554_p9 = pnand %p553_p8, %p547_p5 }
  0x17   :  { %557 = shalt.err (!%p554_p9)
}
  0x18   :  { %s608_s28 = smov 128   ;;  %s609_s29 = smov 8  }
  0x19   :  { %24 = dma.hbm_to_vmem [thread:$0]  %s668_s0, 256, %s19_s26, [#allocation3], %s608_s28, %s608_s28, %s609_s29  }
  0x1a   :  { %s610_s1 = smov [#allocation7]  }
  0x1b   :  { %s44_s7 = sshll.u32 %s610_s1, 4  ;;  %s45_s7 = int_to_ptr.vmem [resolvable:$true] %s44_s7 }
  0x1c   :  { %s566_s8 = scalar_lea.vmem %s45_s7, 1024  ;;  %p571_p11 = scmp.lt.s32.totalorder %s45_s7, %s45_s7 }
  0x1d   :  { %p567_p10 = scmp.ne.s32.totalorder %s45_s7, %s566_s8  ;;  %p572_p12 = scmp.lt.s32.totalorder %s566_s8, %s566_s8 }
  0x1f   :  { %p573_p13 = por %p572_p12, %p571_p11 }
  0x21   :  { %p574_p0 = pnand %p573_p13, %p567_p10 }
  0x23   :  { %577 = shalt.err (!%p574_p0)
}
  0x24   :  { %50 = dma.hbm_to_vmem [thread:$0]  %s671_s3, 1024, %s45_s7, [#allocation6], %s605_s21, %s605_s21, %s606_s22  }
  0x25   :  { %598 = dma.done.wait [#allocation3], 256  }
  0x26   :  { %599 = vsyncadd [#allocation3], 4294967040 }
  0x27   :  { %600 = dma.done.wait [#allocation6], 3072  }
  0x28   :  { %601 = vsyncadd [#allocation6], 4294964224  ;;  %v611_v0 = vmov 0.0   ;;  %v487_v1 = vld [vmem:[#allocation5 + $0x78] sm:$0xff]   ;;  %v489_v3 = vld [vmem:[#allocation5 + $0x70] sm:$0xff]   ;;  %vm612_vm0 = vmmov 0  }
  0x29   :  { %457 = vmatprep.subr.bf16.mxu1 %v611_v0  ;;  %v488_v2 = vld [vmem:[#allocation5 + $0x38] sm:$0xff]   ;;  %426 = vmatprep.subr.bf16.mxu0 %v487_v1  ;;  %v490_v4 = vld [vmem:[#allocation5 + $0x30] sm:$0xff]   ;;  %v491_v5 = vld [vmem:[#allocation5 + $0x68] sm:$0xff]  }
  0x2a   :  { %427 = vmatpush3.bf16.msra.mxu0 %v488_v2  ;;  %v492_v6 = vld [vmem:[#allocation5 + $0x28] sm:$0xff]   ;;  %v493_v7 = vld [vmem:[#allocation5 + $0x60] sm:$0xff]   ;;  %v495_v9 = vld [vmem:[#allocation5 + $0x58] sm:$0xff]   ;;  %473 = vmatprep.mubr.msk.bf16.mxu1 %vm612_vm0, %v611_v0 }
  0x2b   :  { %428 = vmatprep.subr.bf16.mxu0 %v489_v3  ;;  %v494_v8 = vld [vmem:[#allocation5 + $0x20] sm:$0xff]   ;;  %v496_v10 = vld [vmem:[#allocation5 + $0x18] sm:$0xff]   ;;  %v497_v11 = vld [vmem:[#allocation5 + $0x50] sm:$0xff]  }
  0x2c   :  { %v498_v12 = vld [vmem:[#allocation5 + $0x10] sm:$0xff]   ;;  %v506_v14 = vld [vmem:[#allocation7 + $0x38] sm:$0xff]   ;;  %v499_v15 = vld [vmem:[#allocation5 + $0x48] sm:$0xff]  }
  0x2d   :  { %v505_v13 = vld [vmem:[#allocation2 + $0x4] ss:$8 sps:$4 sm:$0xff]   ;;  %458 = vmatpush3.bf16.msra.mxu1 %v506_v14  ;;  %v500_v17 = vld [vmem:[#allocation5 + $0x8] sm:$0xff]   ;;  %v501_v18 = vld [vmem:[#allocation5 + $0x40] sm:$0xff]  }
  0x2e   :  { %429 = vmatpush3.bf16.msra.mxu0 %v490_v4  ;;  %242 = vmatprep.mubr.bf16.mxu0 %v505_v13  ;;  %v507_v16 = vld [vmem:[#allocation7 + $0x30] sm:$0xff]   ;;  %v508_v19 = vld [vmem:[#allocation7 + $0x28] sm:$0xff]   ;;  %v502_v20 = vld [vmem:[#allocation5] sm:$0xff]  }
  0x2f   :  { %430 = vmatprep.subr.bf16.mxu0 %v491_v5  ;;  %459 = vmatprep.subr.bf16.mxu1 %v611_v0  ;;  %v509_v21 = vld [vmem:[#allocation7 + $0x20] sm:$0xff]   ;;  %v503_v22 = vld [vmem:[#allocation2] ss:$8 sps:$4 sm:$0xff]   ;;  %v512_v25 = vld [vmem:[#allocation7 + $0x8] sm:$0xff]  }
  0x30   :  { %v510_v23 = vld [vmem:[#allocation7 + $0x18] sm:$0xff]   ;;  %v511_v24 = vld [vmem:[#allocation7 + $0x10] sm:$0xff]   ;;  %v513_v26 = vld [vmem:[#allocation7] sm:$0xff]  }
  0x31   :  { %460 = vmatpush3.bf16.msra.mxu1 %v507_v16  ;;  %v398_v30 = vld [vmem:[%s670_s2] ss:$0 sm:$0xff]  ;;  %s613_s2 = smov [#allocation8]  }
  0x32   :  { %431 = vmatpush3.bf16.msra.mxu0 %v492_v6  ;;  %461 = vmatprep.subr.bf16.mxu1 %v611_v0  ;;  %v417_v39 = vld [vmem:[%s672_s4] ss:$0 sm:$0xff]  ;;  %s385_s4 = sshll.u32 %s613_s2, 4  ;;  %s386_s4 = int_to_ptr.vmem [resolvable:$true] %s385_s4 }
  0x33   :  { %432 = vmatprep.subr.bf16.mxu0 %v493_v7  ;;  %s578_s13 = scalar_lea.vmem %s386_s4, 256  ;;  %p583_p2 = scmp.lt.s32.totalorder %s386_s4, %s386_s4 }
  0x34   :  { %p579_p1 = scmp.ne.s32.totalorder %s386_s4, %s578_s13  ;;  %p584_p3 = scmp.lt.s32.totalorder %s578_s13, %s578_s13 }
  0x35   :  { %462 = vmatpush3.bf16.msra.mxu1 %v508_v19 }
  0x36   :  { %433 = vmatpush3.bf16.msra.mxu0 %v494_v8  ;;  %463 = vmatprep.subr.bf16.mxu1 %v611_v0  ;;  %p585_p4 = por %p584_p3, %p583_p2 }
  0x37   :  { %434 = vmatprep.subr.bf16.mxu0 %v495_v9 }
  0x38   :  { %p586_p5 = pnand %p585_p4, %p579_p1 }
  0x39   :  { %464 = vmatpush3.bf16.msra.mxu1 %v509_v21 }
  0x3a   :  { %435 = vmatpush3.bf16.msra.mxu0 %v496_v10  ;;  %465 = vmatprep.subr.bf16.mxu1 %v611_v0 }
  0x3b   :  { %436 = vmatprep.subr.bf16.mxu0 %v497_v11 }
  0x3d   :  { %466 = vmatpush3.bf16.msra.mxu1 %v510_v23 }
  0x3e   :  { %437 = vmatpush3.bf16.msra.mxu0 %v498_v12  ;;  %467 = vmatprep.subr.bf16.mxu1 %v611_v0 }
  0x3f   :  { %438 = vmatprep.subr.bf16.mxu0 %v499_v15 }
  0x41   :  { %468 = vmatpush3.bf16.msra.mxu1 %v511_v24 }
  0x42   :  { %439 = vmatpush3.bf16.msra.mxu0 %v500_v17  ;;  %469 = vmatprep.subr.bf16.mxu1 %v611_v0 }
  0x43   :  { %440 = vmatprep.subr.bf16.mxu0 %v501_v18 }
  0x45   :  { %470 = vmatpush3.bf16.msra.mxu1 %v512_v25 }
  0x46   :  { %441 = vmatpush3.bf16.msra.mxu0 %v502_v20  ;;  %471 = vmatprep.subr.bf16.mxu1 %v611_v0 }
  0x49   :  { %243 = vmatmul.mubr.bf16.vlgmr.msra.gmra.mxu0 %v503_v22  ;;  %472 = vmatpush3.bf16.msra.mxu1 %v513_v26 }
 0x109   :  { %v442_v27 = vpop.f32.mrf.mxu0 }
 0x10b   :  { %v443_v28 = vpop.f32.mrf.mxu0 }
 0x10c   :  { %v444_v29 = vadd.f32 %v443_v28, %v442_v27 }
 0x10d   :  { %v445_v31 = vpop.f32.mrf.mxu0 }
 0x10e   :  { %v245_v33 = vadd.f32 %v444_v29, %v398_v30 }
 0x10f   :  { %v446_v32 = vpop.f32.mrf.mxu0 }
 0x110   :  { %v447_v34 = vadd.f32 %v446_v32, %v445_v31  ;;  %v251_v36 = vmax.f32 %v245_v33, 0.0 }
 0x112   :  { %v248_v35 = vadd.f32 %v447_v34, %v398_v30 }
 0x114   :  { %v252_v37 = vmax.f32 %v248_v35, 0.0 }
 0x116   :  { %v253_v38 = vpack.c.bf16 %v252_v37, %v251_v36 }
 0x118   :  { %474 = vmatmul.mubr.bf16.vlgmr.msra.gmra.mxu1 %v253_v38 }
 0x1d8   :  { %v359_v40 = vpop.f32.mrf.mxu1 }
 0x1d9   :  { %v360_v41 = vadd.f32 %v417_v39, %v359_v40 }
 0x1da   :  { %v475_v42 = vpop.f32.mrf.mxu1 }
 0x1db   :  { %v366_v43 = vmul.f32 %v360_v41, %v360_v41 }
 0x1dc   :  { %v362_v44 = vpop.f32.mrf.mxu1 }
 0x1dd   :  { %v363_v45 = vadd.f32 %v417_v39, %v362_v44  ;;  %368 = vadd.xlane.f32.xlu0 %v366_v43 }
 0x1de   :  { %v476_v46 = vpop.f32.mrf.mxu1 }
 0x1df   :  { %v367_v47 = vmul.f32 %v363_v45, %v363_v45 }
 0x1e1   :  { %370 = vadd.xlane.f32.xlu0 %v367_v47 }
 0x266   :  { %v369_v48 = vpop.xlane.xlu0 %368 }
 0x267   :  { %v372_v49 = vmax.f32 %v369_v48, 1e-24 }
 0x269   :  { %514 = vrsqrt.f32 %v372_v49 }
 0x26a   :  { %v371_v50 = vpop.xlane.xlu0 %370 }
 0x26b   :  { %v373_v51 = vmax.f32 %v371_v50, 1e-24 }
 0x26d   :  { %516 = vrsqrt.f32 %v373_v51 }
 0x276   :  { %v515_v52 = vpop.eup %514 }
 0x277   :  { %v376_v53 = vmul.f32 %v515_v52, %v360_v41 }
 0x279   :  { %378 = vst [vmem:[#allocation8] sm:$0xff] %v376_v53 }
 0x27a   :  { %v517_v54 = vpop.eup %516 }
 0x27b   :  { %v377_v55 = vmul.f32 %v517_v54, %v363_v45 }
 0x27d   :  { %379 = vst [vmem:[#allocation8 + $0x8] sm:$0xff] %v377_v55 }
 0x27e   :  { %589 = shalt.err (!%p586_p5)
}
 0x27f   :  { %391 = dma.vmem_to_hbm [thread:$0]  %s386_s4, 256, %s673_s5, [#allocation4], %s608_s28, %s608_s28, %s609_s29  }
 0x280   :  { %602 = dma.done.wait [#allocation4], 256  }
 0x281   :  { %603 = vsyncadd [#allocation4], 4294967040 }
 0x282   :  { %395 = vsyncpa [#allocation3], 1 }
 0x283   :  { %396 = vsyncpa [#allocation6], 1 }
 0x284   :  { %397 = vsyncpa [#allocation4], 1 }

</bundles_post_ra>
